<compile_context>
chip_gen: v7x
topology: tpu7x:2x2x1
jax: 0.10.0
libtpu: 0.0.40
codegen_flags: <defaults>
</compile_context>

<pallas_src>
import functools

import jax
import jax.numpy as jnp
from jax import lax
from jax.experimental import pallas as pl
from jax.experimental.pallas import tpu as pltpu

_LANES = 128
_CHUNK = 8 * _LANES                      # 1024: minimal padding granularity
_PREF_SUB_ROWS = 64                      # (64,128) f32 sub-tile = 32 KiB = 8 vregs
_TARGET_BLOCK_BYTES = 4 * 1024 * 1024    # ~4 MiB of each input per grid step
_VMEM_LIMIT_BYTES = 32 * 1024 * 1024


def _combined_loss_kernel(o_ref, t_ref, sse_ref, sre_ref, sse_acc, sre_acc, *,
                          block_rows, sub_rows, rows_valid, blocks_per_core):
    """Accumulate sum((o-t)^2) and sum(|(t-o)/(t+1e-8)|) for one core's blocks."""
    p = pl.program_id(0)            # parallel (core) axis
    i = pl.program_id(1)            # sequential reduction axis

    @pl.when(i == 0)
    def _():
        sse_acc[...] = jnp.zeros_like(sse_acc)
        sre_acc[...] = jnp.zeros_like(sre_acc)

    # Global row offset of this *logical* block.  Blocks whose logical index
    # runs past the array are clamped to the last block by the index_map and
    # are fully masked out here, so they contribute exactly 0.
    base_row = (p * blocks_per_core + i) * block_rows
    row_iota = lax.broadcasted_iota(jnp.int32, (sub_rows, _LANES), 0)
    n_sub = block_rows // sub_rows

    def body(j, carry):
        off = pl.multiple_of(j * sub_rows, sub_rows)
        o = o_ref[pl.ds(off, sub_rows), :].astype(jnp.float32)
        t = t_ref[pl.ds(off, sub_rows), :].astype(jnp.float32)
        # Mask rows past the valid range (tail of the last block and any fully
        # out-of-range block of the parallel split).  Masking the inputs makes
        # both terms exactly 0 on junk rows (never Inf/NaN in the ratio).
        valid = row_iota < (rows_valid - base_row - off)
        o = jnp.where(valid, o, 0.0)
        t = jnp.where(valid, t, 0.0)
        diff = o - t
        sse_acc[...] += diff * diff
        # Exact reciprocal keeps ~1e-7 agreement with the reference division.
        sre_acc[...] += jnp.abs(diff * pl.reciprocal(t + 1e-8, approx=False))
        return carry

    lax.fori_loop(0, n_sub, body, 0)

    @pl.when(i == pl.num_programs(1) - 1)
    def _():
        # Single final cross-lane/sublane reduce per core.
        sse_ref[...] = jnp.sum(sse_acc[...]).reshape(1, 1, 1)
        sre_ref[...] = jnp.sum(sre_acc[...]).reshape(1, 1, 1)


def combined_loss(outputs, targets, *, reduction="sum", alpha=0.5):
    """JAX/Pallas equivalent of CombinedLoss.forward(outputs, targets)."""
    assert outputs.shape == targets.shape
    n = outputs.size

    flat_o = outputs.reshape(-1)
    flat_t = targets.reshape(-1)

    # Pad (zeros on both sides) only to the next multiple of 1024 elements so
    # the data reshapes to a (rows, 128) slab with rows a multiple of 8.
    # Padded zeros contribute exactly 0 to both sums.  At most 1023 elements
    # of pad (none when n is already 1024-aligned).
    padded = -(-n // _CHUNK) * _CHUNK
    if padded != n:
        pad = padded - n
        flat_o = jnp.concatenate([flat_o, jnp.zeros((pad,), flat_o.dtype)])
        flat_t = jnp.concatenate([flat_t, jnp.zeros((pad,), flat_t.dtype)])

    rows = padded // _LANES                       # multiple of 8
    o2d = flat_o.reshape(rows, _LANES)
    t2d = flat_t.reshape(rows, _LANES)

    # Block sizing by bytes: ~4 MiB of each input per grid step regardless of
    # dtype, so the fixed ~0.35 us/step overhead stays <10% of DMA time.
    itemsize = max(o2d.dtype.itemsize, t2d.dtype.itemsize)
    target_rows = max(_PREF_SUB_ROWS,
                      (_TARGET_BLOCK_BYTES // (_LANES * itemsize))
                      // _PREF_SUB_ROWS * _PREF_SUB_ROWS)
    block_rows = min(target_rows, rows)
    sub_rows = _PREF_SUB_ROWS if block_rows % _PREF_SUB_ROWS == 0 else 8

    num_blocks = -(-rows // block_rows)
    # Split the stream across two cores when there is more than one block: on
    # v7x the "parallel" axis maps to the two TensorCores; on v5e/v6e it is a
    # cheap outer loop.
    n_split = 2 if num_blocks > 1 else 1
    blocks_per_core = -(-num_blocks // n_split)

    def in_idx(p, i):
        # Clamp so no block starts past the end of the array; clamped blocks
        # are fully masked inside the kernel and contribute 0.
        return (jnp.minimum(p * blocks_per_core + i, num_blocks - 1), 0)

    kernel = functools.partial(
        _combined_loss_kernel,
        block_rows=block_rows, sub_rows=sub_rows,
        rows_valid=rows, blocks_per_core=blocks_per_core)

    cost = pl.CostEstimate(
        flops=8 * padded, transcendentals=0,
        bytes_accessed=padded * (o2d.dtype.itemsize + t2d.dtype.itemsize)
        + 8 * n_split)

    sse, sre = pl.pallas_call(
        kernel,
        out_shape=(
            jax.ShapeDtypeStruct((n_split, 1, 1), jnp.float32),
            jax.ShapeDtypeStruct((n_split, 1, 1), jnp.float32),
        ),
        grid_spec=pltpu.PrefetchScalarGridSpec(
            num_scalar_prefetch=0,
            grid=(n_split, blocks_per_core),
            in_specs=[
                pl.BlockSpec((block_rows, _LANES), in_idx),
                pl.BlockSpec((block_rows, _LANES), in_idx),
            ],
            out_specs=[
                pl.BlockSpec((1, 1, 1), lambda p, i: (p, 0, 0)),
                pl.BlockSpec((1, 1, 1), lambda p, i: (p, 0, 0)),
            ],
            scratch_shapes=[
                pltpu.VMEM((sub_rows, _LANES), jnp.float32),
                pltpu.VMEM((sub_rows, _LANES), jnp.float32),
            ],
        ),
        compiler_params=pltpu.CompilerParams(
            dimension_semantics=("parallel", "arbitrary"),
            vmem_limit_bytes=_VMEM_LIMIT_BYTES,
        ),
        cost_estimate=cost,
    )(o2d, t2d)

    sse = jnp.sum(sse)
    sre = jnp.sum(sre)

    # e1 = nn.MSELoss(reduction=...)(outputs, targets)
    if reduction == "sum":
        e1 = sse
    elif reduction in ("mean", "avg"):
        e1 = sse / n
    else:
        # TODO(synk): 'max' is not a valid nn.MSELoss reduction; the original
        # module would fail inside nn.MSELoss as well.
        raise TypeError("Unrecognised reduction type %s" % reduction)

    # e2 = mean(|(t - o) / (t + 1e-8)|); loss_reduction of a 0-d scalar under
    # sum/mean/max returns the scalar unchanged.
    e2 = sre / n

    return alpha * e1 + (1.0 - alpha) * e2


def _reference_combined_loss(outputs, targets, *, reduction="sum", alpha=0.5):
    diff = outputs - targets
    if reduction == "sum":
        e1 = jnp.sum(diff * diff)
    else:
        e1 = jnp.mean(diff * diff)
    e2 = jnp.mean(jnp.abs((targets - outputs) / (targets + 1e-8)))
    return alpha * e1 + (1.0 - alpha) * e2


if __name__ == "__main__":
    key = jax.random.PRNGKey(0)
    k1, k2 = jax.random.split(key)
    # Small NCHW-style tensors, as a segmentation/regression head would emit.
    outputs = jax.random.normal(k1, (2, 4, 16, 16), dtype=jnp.float32)
    targets = jax.random.normal(k2, (2, 4, 16, 16), dtype=jnp.float32) + 1.0

    loss = jax.block_until_ready(
        combined_loss(outputs, targets, reduction="sum", alpha=0.5))
    ref = _reference_combined_loss(outputs, targets, reduction="sum", alpha=0.5)

    assert jnp.allclose(loss, ref, rtol=1e-5, atol=1e-5), (loss, ref)
    print("KERNEL_OK")
</pallas_src>

<mosaic_0001>
module attributes {stable_mosaic.version = 11 : i64} {
  func.func @_combined_loss_kernel(%arg0: i32, %arg1: i32, %arg2: memref<16x128xf32, #tpu.memory_space<vmem>>, %arg3: memref<16x128xf32, #tpu.memory_space<vmem>>, %arg4: memref<1x1x1xf32, #tpu.memory_space<vmem>>, %arg5: memref<1x1x1xf32, #tpu.memory_space<vmem>>, %arg6: memref<8x128xf32, #tpu.memory_space<vmem>>, %arg7: memref<8x128xf32, #tpu.memory_space<vmem>>) attributes {dimension_semantics = [#tpu.dimension_semantics<parallel>, #tpu.dimension_semantics<arbitrary>], iteration_bounds = array<i64: 1, 1>, scalar_prefetch = 0 : i64, scratch_operands = 2 : i64, tpu.core_type = #tpu.core_type<tc>, window_params = [{transform_indices = @transform_0, window_bounds = array<i64: 16, 128>}, {transform_indices = @transform_1, window_bounds = array<i64: 16, 128>}, {transform_indices = @transform_2, window_bounds = array<i64: 1, 1, 1>}, {transform_indices = @transform_3, window_bounds = array<i64: 1, 1, 1>}]} {
    %c0_i32 = arith.constant 0 : i32
    %0 = arith.cmpi eq, %arg1, %c0_i32 : i32
    %1 = arith.extui %0 : i1 to i32
    %c0_i32_0 = arith.constant 0 : i32
    %2 = arith.cmpi ne, %1, %c0_i32_0 : i32
    scf.if %2 {
      %cst = arith.constant 0.000000e+00 : f32
      %11 = vector.broadcast %cst : f32 to vector<8x128xf32>
      %c0 = arith.constant 0 : index
      %c0_6 = arith.constant 0 : index
      %12 = vector.load %arg6[%c0, %c0_6] : memref<8x128xf32, #tpu.memory_space<vmem>>, vector<8x128xf32>
      tpu.vector_store %arg6[%c0, %c0_6], %11 {strides = array<i32>} : memref<8x128xf32, #tpu.memory_space<vmem>>, vector<8x128xf32>,
      %cst_7 = arith.constant 0.000000e+00 : f32
      %13 = vector.broadcast %cst_7 : f32 to vector<8x128xf32>
      %c0_8 = arith.constant 0 : index
      %c0_9 = arith.constant 0 : index
      %14 = vector.load %arg7[%c0_8, %c0_9] : memref<8x128xf32, #tpu.memory_space<vmem>>, vector<8x128xf32>
      tpu.vector_store %arg7[%c0_8, %c0_9], %13 {strides = array<i32>} : memref<8x128xf32, #tpu.memory_space<vmem>>, vector<8x128xf32>,
    } else {
    }
    %c1_i32 = arith.constant 1 : i32
    %3 = arith.muli %arg0, %c1_i32 : i32
    %4 = arith.addi %3, %arg1 : i32
    %c16_i32 = arith.constant 16 : i32
    %5 = arith.muli %4, %c16_i32 : i32
    %6 = tpu.iota {dimensions = array<i32: 0>} : vector<8x128xi32>
    %c0_i32_1 = arith.constant 0 : i32
    %c2_i32 = arith.constant 2 : i32
    %7 = arith.addi %c0_i32_1, %c2_i32 : i32
    %c1_i32_2 = arith.constant 1 : i32
    scf.for %arg8 = %c0_i32_1 to %7 step %c1_i32_2  : i32 {
      %c8_i32 = arith.constant 8 : i32
      %11 = arith.muli %arg8, %c8_i32 : i32
      %12 = tpu.assume_multiple %11, 8 : i32
      %13 = arith.index_cast %12 : i32 to index
      %c0 = arith.constant 0 : index
      %14 = vector.load %arg2[%13, %c0] : memref<16x128xf32, #tpu.memory_space<vmem>>, vector<8x128xf32>
      %15 = arith.index_cast %12 : i32 to index
      %c0_6 = arith.constant 0 : index
      %16 = vector.load %arg3[%15, %c0_6] : memref<16x128xf32, #tpu.memory_space<vmem>>, vector<8x128xf32>
      %c16_i32_7 = arith.constant 16 : i32
      %17 = arith.subi %c16_i32_7, %5 : i32
      %18 = arith.subi %17, %12 : i32
      %19 = vector.broadcast %18 : i32 to vector<8x128xi32>
      %20 = arith.cmpi slt, %6, %19 : vector<8x128xi32>
      %cst = arith.constant 0.000000e+00 : f32
      %21 = vector.broadcast %cst : f32 to vector<8x128xf32>
      %22 = arith.select %20, %14, %21 : vector<8x128xi1>, vector<8x128xf32>
      %cst_8 = arith.constant 0.000000e+00 : f32
      %23 = vector.broadcast %cst_8 : f32 to vector<8x128xf32>
      %24 = arith.select %20, %16, %23 : vector<8x128xi1>, vector<8x128xf32>
      %25 = arith.subf %22, %24 : vector<8x128xf32>
      %c0_9 = arith.constant 0 : index
      %c0_10 = arith.constant 0 : index
      %26 = vector.load %arg6[%c0_9, %c0_10] : memref<8x128xf32, #tpu.memory_space<vmem>>, vector<8x128xf32>
      %27 = arith.mulf %25, %25 : vector<8x128xf32>
      %28 = arith.addf %26, %27 : vector<8x128xf32>
      %c0_11 = arith.constant 0 : index
      %c0_12 = arith.constant 0 : index
      %29 = vector.load %arg6[%c0_11, %c0_12] : memref<8x128xf32, #tpu.memory_space<vmem>>, vector<8x128xf32>
      tpu.vector_store %arg6[%c0_11, %c0_12], %28 {strides = array<i32>} : memref<8x128xf32, #tpu.memory_space<vmem>>, vector<8x128xf32>,
      %c0_13 = arith.constant 0 : index
      %c0_14 = arith.constant 0 : index
      %30 = vector.load %arg7[%c0_13, %c0_14] : memref<8x128xf32, #tpu.memory_space<vmem>>, vector<8x128xf32>
      %cst_15 = arith.constant 9.99999993E-9 : f32
      %31 = vector.broadcast %cst_15 : f32 to vector<8x128xf32>
      %32 = arith.addf %24, %31 : vector<8x128xf32>
      %33 = tpu.reciprocal %32 : vector<8x128xf32> -> vector<8x128xf32>
      %34 = arith.mulf %25, %33 : vector<8x128xf32>
      %35 = math.absf %34 : vector<8x128xf32>
      %36 = arith.addf %30, %35 : vector<8x128xf32>
      %c0_16 = arith.constant 0 : index
      %c0_17 = arith.constant 0 : index
      %37 = vector.load %arg7[%c0_16, %c0_17] : memref<8x128xf32, #tpu.memory_space<vmem>>, vector<8x128xf32>
      tpu.vector_store %arg7[%c0_16, %c0_17], %36 {strides = array<i32>} : memref<8x128xf32, #tpu.memory_space<vmem>>, vector<8x128xf32>,
    }
    %c2_i32_3 = arith.constant 2 : i32
    %c0_i32_4 = arith.constant 0 : i32
    %8 = arith.cmpi eq, %arg1, %c0_i32_4 : i32
    %9 = arith.extui %8 : i1 to i32
    %c0_i32_5 = arith.constant 0 : i32
    %10 = arith.cmpi ne, %9, %c0_i32_5 : i32
    scf.if %10 {
      %c0 = arith.constant 0 : index
      %c0_6 = arith.constant 0 : index
      %11 = vector.load %arg6[%c0, %c0_6] : memref<8x128xf32, #tpu.memory_space<vmem>>, vector<8x128xf32>
      %12 = vector.shape_cast %11 : vector<8x128xf32> to vector<1x8x128xf32>
      %cst = arith.constant dense<0.000000e+00> : vector<1xf32>
      %13 = vector.multi_reduction <add>, %12, %cst [1, 2] : vector<1x8x128xf32> to vector<1xf32>
      %14 = vector.shape_cast %13 : vector<1xf32> to vector<1x1x1xf32>
      %15 = vector.extract %14[0, 0, 0] : f32 from vector<1x1x1xf32>
      %16 = vector.broadcast %15 : f32 to vector<1x1x1xf32>
      %c0_7 = arith.constant 0 : index
      %c0_8 = arith.constant 0 : index
      %c0_9 = arith.constant 0 : index
      %17 = vector.load %arg4[%c0_7, %c0_8, %c0_9] : memref<1x1x1xf32, #tpu.memory_space<vmem>>, vector<1x1x1xf32>
      tpu.vector_store %arg4[%c0_7, %c0_8, %c0_9], %16 {strides = array<i32>} : memref<1x1x1xf32, #tpu.memory_space<vmem>>, vector<1x1x1xf32>,
      %c0_10 = arith.constant 0 : index
      %c0_11 = arith.constant 0 : index
      %18 = vector.load %arg7[%c0_10, %c0_11] : memref<8x128xf32, #tpu.memory_space<vmem>>, vector<8x128xf32>
      %19 = vector.shape_cast %18 : vector<8x128xf32> to vector<1x8x128xf32>
      %cst_12 = arith.constant dense<0.000000e+00> : vector<1xf32>
      %20 = vector.multi_reduction <add>, %19, %cst_12 [1, 2] : vector<1x8x128xf32> to vector<1xf32>
      %21 = vector.shape_cast %20 : vector<1xf32> to vector<1x1x1xf32>
      %22 = vector.extract %21[0, 0, 0] : f32 from vector<1x1x1xf32>
      %23 = vector.broadcast %22 : f32 to vector<1x1x1xf32>
      %c0_13 = arith.constant 0 : index
      %c0_14 = arith.constant 0 : index
      %c0_15 = arith.constant 0 : index
      %24 = vector.load %arg5[%c0_13, %c0_14, %c0_15] : memref<1x1x1xf32, #tpu.memory_space<vmem>>, vector<1x1x1xf32>
      tpu.vector_store %arg5[%c0_13, %c0_14, %c0_15], %23 {strides = array<i32>} : memref<1x1x1xf32, #tpu.memory_space<vmem>>, vector<1x1x1xf32>,
    } else {
    }
    return
  }
  func.func @transform_0(%arg0: i32, %arg1: i32) -> (i32, i32) {
    %c1_i32 = arith.constant 1 : i32
    %0 = arith.muli %arg0, %c1_i32 : i32
    %1 = arith.addi %0, %arg1 : i32
    %c0_i32 = arith.constant 0 : i32
    %2 = arith.minsi %1, %c0_i32 : i32
    %c0_i32_0 = arith.constant 0 : i32
    %c0_i32_1 = arith.constant 0 : i32
    return %2, %c0_i32_0 : i32, i32
  }
  func.func @transform_1(%arg0: i32, %arg1: i32) -> (i32, i32) {
    %c1_i32 = arith.constant 1 : i32
    %0 = arith.muli %arg0, %c1_i32 : i32
    %1 = arith.addi %0, %arg1 : i32
    %c0_i32 = arith.constant 0 : i32
    %2 = arith.minsi %1, %c0_i32 : i32
    %c0_i32_0 = arith.constant 0 : i32
    %c0_i32_1 = arith.constant 0 : i32
    return %2, %c0_i32_0 : i32, i32
  }
  func.func @transform_2(%arg0: i32, %arg1: i32) -> (i32, i32, i32) {
    %c0_i32 = arith.constant 0 : i32
    %c0_i32_0 = arith.constant 0 : i32
    %c0_i32_1 = arith.constant 0 : i32
    return %arg0, %c0_i32, %c0_i32_0 : i32, i32, i32
  }
  func.func @transform_3(%arg0: i32, %arg1: i32) -> (i32, i32, i32) {
    %c0_i32 = arith.constant 0 : i32
    %c0_i32_0 = arith.constant 0 : i32
    %c0_i32_1 = arith.constant 0 : i32
    return %arg0, %c0_i32, %c0_i32_0 : i32, i32, i32
  }
}

</mosaic_0001>

<bundles_post_ra>
// kernel: tpu_custom_call.1
= control target key start
LH: loop header
LB: loop body
LE: loop exit
PB: predicated region body
PF: predicated region fallthrough
CT: control target
= control target key end

     0   :  { %9 = vsyncpa [#allocation5], 0  ;;  %s381_s0 = inlined_call_operand.hbm [shape: f32[16,128], index: 0, kind: input, shape index: {}]   ;;  %s382_s1 = inlined_call_operand.hbm [shape: f32[16,128], index: 1, kind: input, shape index: {}]   ;;  %s383_s2 = inlined_call_operand.hbm [shape: f32[1,1,1], index: 2, kind: output, shape index: {0}]   ;;  %s384_s3 = inlined_call_operand.hbm [shape: f32[1,1,1], index: 3, kind: output, shape index: {1}]  }
   0x1   :  { %10 = vsyncpa [#allocation8], 0 }
   0x2   :  { %11 = vsyncpa [#allocation6], 0 }
   0x3   :  { %12 = vsyncpa [#allocation11], 0  ;;  %s299_s12 = smov [#allocation4]   ;;  %s195_s16 = scalar_lea.hbm %s381_s0, 256 }
   0x4   :  { %s24_s13 = sshll.u32 %s299_s12, 4  ;;  %p196_p0 = scmp.ne.s32.totalorder %s381_s0, %s195_s16  ;;  %s25_s13 = int_to_ptr.vmem [resolvable:$true] %s24_s13 }
   0x5   :  { %p199_p1 = scmp.lt.u32.totalorder %s195_s16, %s381_s0 }
   0x7   :  { %p201_p2 = pnand %p199_p1, %p196_p0 }
   0x9   :  { %204 = shalt.err (!%p201_p2)
}
   0xa   :  { %s205_s21 = scalar_lea.vmem %s25_s13, 256  ;;  %p210_p4 = scmp.lt.s32.totalorder %s25_s13, %s25_s13 }
   0xb   :  { %p206_p3 = scmp.ne.s32.totalorder %s25_s13, %s205_s21  ;;  %p211_p5 = scmp.lt.s32.totalorder %s205_s21, %s205_s21 }
   0xd   :  { %p212_p6 = por %p211_p5, %p210_p4 }
   0xf   :  { %p213_p7 = pnand %p212_p6, %p206_p3 }
  0x11   :  { %216 = shalt.err (!%p213_p7)
}
  0x12   :  { %s300_s22 = smov 128   ;;  %s301_s23 = smov 8  }
  0x13   :  { %30 = dma.hbm_to_vmem [thread:$0]  %s381_s0, 256, %s25_s13, [#allocation5], %s300_s22, %s300_s22, %s301_s23  }
  0x14   :  { %s302_s26 = smov [#allocation7]   ;;  %s217_s30 = scalar_lea.hbm %s382_s1, 256 }
  0x15   :  { %s42_s27 = sshll.u32 %s302_s26, 4  ;;  %p218_p8 = scmp.ne.s32.totalorder %s382_s1, %s217_s30  ;;  %s43_s27 = int_to_ptr.vmem [resolvable:$true] %s42_s27 }
  0x16   :  { %p221_p9 = scmp.lt.u32.totalorder %s217_s30, %s382_s1 }
  0x18   :  { %p223_p10 = pnand %p221_p9, %p218_p8 }
  0x1a   :  { %226 = shalt.err (!%p223_p10)
}
  0x1b   :  { %s227_s8 = scalar_lea.vmem %s43_s27, 256  ;;  %p232_p12 = scmp.lt.s32.totalorder %s43_s27, %s43_s27 }
  0x1c   :  { %p228_p11 = scmp.ne.s32.totalorder %s43_s27, %s227_s8  ;;  %p233_p13 = scmp.lt.s32.totalorder %s227_s8, %s227_s8 }
  0x1e   :  { %p234_p0 = por %p233_p13, %p232_p12 }
  0x20   :  { %p235_p1 = pnand %p234_p0, %p228_p11 }
  0x22   :  { %238 = shalt.err (!%p235_p1)
}
  0x23   :  { %48 = dma.hbm_to_vmem [thread:$0]  %s382_s1, 256, %s43_s27, [#allocation8], %s300_s22, %s300_s22, %s301_s23  }
  0x24   :  { %287 = dma.done.wait [#allocation5], 256  }
  0x25   :  { %288 = vsyncadd [#allocation5], 4294967040 }
  0x26   :  { %289 = dma.done.wait [#allocation8], 256  }
  0x27   :  { %290 = vsyncadd [#allocation8], 4294967040  ;;  %v71_v0 = vlaneseq  ;;  %v303_v1 = vmov 0.0   ;;  %s350_s10 = smov 0  }
  0x28   :  { %67 = vst [vmem:[#allocation2] sm:$0xff] %v303_v1  ;;  %68 = vst [vmem:[#allocation3] sm:$0xff] %v303_v1 }
  0x29   :  { %v72_v2 = vshrl.u32 %v71_v0, 7 }
  0x2a LB: > { %s173_s11 = sshll.u32 %s297_s10, 3  ;;  %s78_s10 = sadd.s32 1, %s297_s10   ;;  %s297_s10 = sphi %s350_s10, %s78_s10  }
  0x2b   : > { %s80_s12 = scalar_lea.vmem [#allocation4], %s173_s11  ;;  %s82_s13 = scalar_lea.vmem [#allocation7], %s173_s11 }
  0x2c   : > { %v81_v3 = vld [vmem:[%s80_s12] sm:$0xff]  ;;  %s85_s1 = ssub.s32 16, %s173_s11  ;;  %p75_p2 = scmp.ge.s32.totalorder %s78_s10, 2  }
  0x2d   : > { %v83_v4 = vld [vmem:[%s82_s13] sm:$0xff]  ;;  %v86_v5 = vstv %s85_s1  ;;  %s304_s14 = smov (%p75_p2), [#allocation9]   ;;  %vm116_vm1 = vcmask (%p75_p2), 0   ;;  %s305_s17 = smov (%p75_p2), [#allocation10]  }
  0x2e   : > { %vm87_vm0 = vcmp.lt.s32.totalorder %v72_v2, %v86_v5  ;;  %s136_s15 = sshll.u32 (%p75_p2), %s304_s14, 4  ;;  %s146_s18 = sshll.u32 (%p75_p2), %s305_s17, 4  ;;  %s137_s15 = int_to_ptr.vmem [resolvable:$true] %s136_s15  ;;  %s147_s18 = int_to_ptr.vmem [resolvable:$true] %s146_s18 }
  0x2f   : > { %v88_v6 = vsel %vm87_vm0, %v81_v3, 0.0  ;;  %v89_v7 = vsel %vm87_vm0, %v83_v4, 0.0  ;;  %v91_v10 = vld [vmem:[#allocation2] sm:$0xff]  ;;  %v95_v15 = vld [vmem:[#allocation3] sm:$0xff]  ;;  %s239_s19 = scalar_lea.vmem (%p75_p2), %s137_s15, 16  ;;  %s243_s20 = scalar_lea.vmem (%p75_p2), %s137_s15, 32 }
  0x30   : > { %v90_v8 = vsub.f32 %v88_v6, %v89_v7  ;;  %v96_v9 = vadd.f32 1e-08, %v89_v7  ;;  %p240_p3 = scmp.ne.s32.totalorder (%p75_p2), %s137_s15, %s239_s19  ;;  %p244_p4 = scmp.lt.s32.totalorder (%p75_p2), %s137_s15, %s137_s15 }
  0x31   :  { %p245_p5 = scmp.lt.s32.totalorder (%p75_p2), %s243_s20, %s239_s19 }
  0x32   : > { %v92_v11 = vmul.f32 %v90_v8, %v90_v8  ;;  %193 = vrcp.f32 %v96_v9 }
  0x33   :  { %p246_p6 = por (%p75_p2), %p245_p5, %p244_p4 }
  0x34   : > { %v93_v12 = vadd.f32 %v92_v11, %v91_v10 }
  0x35   :  { %p247_p7 = pnand (%p75_p2), %p246_p6, %p240_p3 }
  0x36   : > { %94 = vst [vmem:[#allocation2] sm:$0xff] %v93_v12 }
  0x3c   : > { %v194_v13 = vpop.eup %193 }
  0x3d   : > { %v98_v14 = vmul.f32 %v194_v13, %v90_v8  ;;  %77 = sbr.rel (!%p75_p2) target bundleno = 42 (0x2a), region = 63  ;;  %v105_v18 = vld [vmem:[#allocation2] sm:$0xff] (%p75_p2) }
  0x3e   :  { %106 = vadd.xlane.f32.xlu0 (%p75_p2), %v105_v18 }
  0x3f   : > { %v99_v16 = vand.u32 2147483647, %v98_v14 }
  0x41   : > { %v100_v17 = vadd.f32 %v99_v16, %v95_v15 }
  0x43   : > { %101 = vst [vmem:[#allocation3] sm:$0xff] %v100_v17 }
  0x4a   :  { %v118_v19 = vld [vmem:[#allocation3] sm:$0xff] }
  0x4b   :  { %119 = vadd.xlane.f32.xlu0 %v118_v19 }
  0xcb   :  { %v107_v20 = vpop.xlane.xlu0 %106 }
  0xcc   :  { %v108_v21 = vrot.slane %v107_v20, 4 }
  0xce   :  { %v109_v22 = vadd.f32 %v108_v21, %v107_v20 }
  0xd0   :  { %v110_v24 = vrot.slane %v109_v22, 2 }
  0xd2   :  { %v111_v27 = vadd.f32 %v110_v24, %v109_v22 }
  0xd4   :  { %v112_v29 = vrot.slane %v111_v27, 1 }
  0xd6   :  { %v113_v31 = vadd.f32 %v112_v29, %v111_v27 }
  0xd8   :  { %v120_v23 = vpop.xlane.xlu0 %119  ;;  %174 = vpush %v113_v31 }
  0xd9   :  { %v121_v25 = vrot.slane %v120_v23, 4 }
  0xdb   :  { %v122_v26 = vadd.f32 %v121_v25, %v120_v23 }
  0xdd   :  { %v123_v28 = vrot.slane %v122_v26, 2 }
  0xdf   :  { %v124_v30 = vadd.f32 %v123_v28, %v122_v26 }
  0xe1   :  { %v125_v32 = vrot.slane %v124_v30, 1 }
  0xe3   :  { %v126_v33 = vadd.f32 %v125_v32, %v124_v30 }
  0xe5   :  { %176 = vpush %v126_v33 }
 0x109   :  { %s175_s16 = spop %174 }
 0x10a   :  { %v115_v34 = vstv %s175_s16 }
 0x10b   :  { %117 = vst.msk [vmem:[#allocation9] sm:$0x1] %vm116_vm1, %v115_v34 }
 0x10c   :  { %250 = shalt.err (!%p247_p7)
}
 0x10d   :  { %s251_s23 = scalar_lea.hbm %s383_s2, 16 }
 0x10e   :  { %p252_p8 = scmp.ne.s32.totalorder %s383_s2, %s251_s23  ;;  %p255_p9 = scmp.lt.u32.totalorder %s251_s23, %s383_s2 }
 0x110   :  { %p257_p10 = pnand %p255_p9, %p252_p8 }
 0x112   :  { %260 = shalt.err (!%p257_p10)
}
 0x113   :  { %139 = dma.vmem_to_hbm [thread:$0]  %s137_s15, 16, %s383_s2, [#allocation6]  }
 0x114   :  { %s261_s4 = scalar_lea.vmem %s147_s18, 16  ;;  %s265_s5 = scalar_lea.vmem %s147_s18, 32 }
 0x115   :  { %p262_p11 = scmp.ne.s32.totalorder %s147_s18, %s261_s4  ;;  %p266_p12 = scmp.lt.s32.totalorder %s147_s18, %s147_s18 }
 0x116   :  { %s177_s30 = spop %176  ;;  %p267_p13 = scmp.lt.s32.totalorder %s265_s5, %s261_s4 }
 0x117   :  { %v128_v35 = vstv %s177_s30 }
 0x118   :  { %129 = vst.msk [vmem:[#allocation10] sm:$0x1] %vm116_vm1, %v128_v35  ;;  %p268_p0 = por %p267_p13, %p266_p12 }
 0x11a   :  { %p269_p1 = pnand %p268_p0, %p262_p11 }
 0x11c   :  { %272 = shalt.err (!%p269_p1)
}
 0x11d   :  { %s273_s8 = scalar_lea.hbm %s384_s3, 16 }
 0x11e   :  { %p274_p2 = scmp.ne.s32.totalorder %s384_s3, %s273_s8  ;;  %p277_p3 = scmp.lt.u32.totalorder %s273_s8, %s384_s3 }
 0x120   :  { %p279_p4 = pnand %p277_p3, %p274_p2 }
 0x122   :  { %282 = shalt.err (!%p279_p4)
}
 0x123   :  { %149 = dma.vmem_to_hbm [thread:$0]  %s147_s18, 16, %s384_s3, [#allocation11]  }
 0x124   :  { %291 = dma.done.wait [#allocation6], 16  }
 0x125   :  { %292 = vsyncadd [#allocation6], 4294967280 }
 0x126   :  { %293 = dma.done.wait [#allocation11], 16  }
 0x127   :  { %294 = vsyncadd [#allocation11], 4294967280 }
 0x128   :  { %156 = vsyncpa [#allocation5], 1 }
 0x129   :  { %157 = vsyncpa [#allocation8], 1 }
 0x12a   :  { %158 = vsyncpa [#allocation6], 1 }
 0x12b   :  { %159 = vsyncpa [#allocation11], 1 }

</bundles_post_ra>
